<compile_context>
chip_gen: v7x
topology: tpu7x:2x2x1
jax: 0.10.0
libtpu: 0.0.40
codegen_flags: <defaults>
</compile_context>

<pallas_src>
import jax
import jax.numpy as jnp
from jax.experimental import pallas as pl
from jax.experimental.pallas import tpu as pltpu

KSIZE = 7
PAD = (KSIZE - 1) // 2  # padding = 3 for nn.Conv2d(2, 1, 7, padding=3, bias=False)

# Guard for the dense-Toeplitz operand (bytes); beyond this, use the banded form.
_MAX_TCAT_BYTES = 24 * 1024 * 1024


def build_spatial_conv_matrix(w, H, W, C, dtype=jnp.bfloat16):
    """(1, 2, K, K) conv weight -> fused (2*H*W, H*W) dense 'same'-conv matrix.

    Row block 0 (first H*W rows) is the avg path with the 1/C channel-mean
    scale folded in (so the kernel feeds the raw channel *sum*); row block 1 is
    the max path.  T[c*HW + i*W + j, h*W + ww] = w[0, c, i-h+PAD, j-ww+PAD] for
    taps inside the kernel window, else 0 (zeros encode the conv zero padding).

    Build this ONCE per conv weight (cache it outside the forward path) and
    pass it to spatial_attention via t_cat=.
    """
    K = w.shape[-1]
    pad = (K - 1) // 2
    i = jnp.arange(H)[:, None, None, None]      # input row
    j = jnp.arange(W)[None, :, None, None]      # input col
    h = jnp.arange(H)[None, None, :, None]      # output row
    ww = jnp.arange(W)[None, None, None, :]     # output col
    dy = i - h + pad
    dx = j - ww + pad
    valid = (dy >= 0) & (dy < K) & (dx >= 0) & (dx < K)
    taps = w[0].astype(jnp.float32)[:, jnp.clip(dy, 0, K - 1), jnp.clip(dx, 0, K - 1)]
    taps = jnp.where(valid[None], taps, 0.0)     # (2, H, W, H, W)
    taps = taps.at[0].multiply(1.0 / C)          # fold channel-mean scale into avg path
    return taps.reshape(2 * H * W, H * W).astype(dtype)


def _sa_kernel_single(x_ref, t_ref, o_ref):
    """Single channel step (Ct == C): no scratch, one fused MXU matmul."""
    # x_ref: (Bt, C, HW) lane-dense; t_ref: (2*HW, HW) bf16; o_ref: (Bt, HW)
    x = x_ref[...].astype(jnp.float32)
    s = jnp.sum(x, axis=1)                       # channel sum (mean scale is in T)
    m = jnp.max(x, axis=1)                       # channel max
    sm = jnp.concatenate([s, m], axis=-1).astype(t_ref.dtype)       # (Bt, 2*HW)
    logits = jnp.dot(sm, t_ref[...], preferred_element_type=jnp.float32)
    o_ref[...] = jax.nn.sigmoid(logits).astype(o_ref.dtype)


def _sa_kernel_tiled(x_ref, t_ref, o_ref, sum_ref, max_ref):
    """Channel-tiled path: running sum/max accumulators, fused matmul at finalize.

    Channel axis must stay the innermost grid dim ("arbitrary") so the c == 0
    init correctly fences each batch tile.
    """
    c = pl.program_id(1)
    x = x_ref[...].astype(jnp.float32)           # (Bt, Ct, HW)
    part_sum = jnp.sum(x, axis=1)
    part_max = jnp.max(x, axis=1)

    @pl.when(c == 0)
    def _():
        sum_ref[...] = part_sum
        max_ref[...] = part_max

    @pl.when(c > 0)
    def _():
        sum_ref[...] += part_sum
        max_ref[...] = jnp.maximum(max_ref[...], part_max)

    @pl.when(c == pl.num_programs(1) - 1)
    def _():
        sm = jnp.concatenate([sum_ref[...], max_ref[...]], axis=-1).astype(t_ref.dtype)
        logits = jnp.dot(sm, t_ref[...], preferred_element_type=jnp.float32)
        o_ref[...] = jax.nn.sigmoid(logits).astype(o_ref.dtype)


def spatial_attention(x, w, *, t_cat=None, batch_tile=None, channel_tile=None):
    """x: (B, C, H, W), w: (1, 2, 7, 7) -> sigmoid(conv7x7([mean_c; max_c])).

    Returns (B, 1, H, W). x may be f32 or bf16 (bf16 halves HBM traffic for the
    memory-bound channel reduction; sum is still accumulated in f32).
    """
    B, C, H, W = x.shape
    HW = H * W

    if t_cat is None:
        # Prefer building this once per weight outside the forward path.
        t_cat = build_spatial_conv_matrix(w, H, W, C)
    assert t_cat.shape == (2 * HW, HW)
    if t_cat.size * t_cat.dtype.itemsize > _MAX_TCAT_BYTES:
        # TODO(synk): banded per-row Toeplitz matmul for Darknet-scale maps.
        raise NotImplementedError("dense Toeplitz conv operand exceeds VMEM budget")

    # Batch tiling: 8-aligned tiles; split into >=2 tiles when B allows it so
    # v7x's two TensorCores both get work on the "parallel" axis.
    if batch_tile is None:
        Bt = B // 2 if (B % 2 == 0 and (B // 2) % 8 == 0) else B
    else:
        Bt = batch_tile
    Ct = C if channel_tile is None else channel_tile
    assert B % Bt == 0 and C % Ct == 0
    assert Bt == B or Bt % 8 == 0, "batch tile must be 8-aligned when tiling"
    assert Ct == C or Ct % 8 == 0, "channel tile must be 8-aligned when tiling"

    x_flat = x.reshape(B, C, HW)                 # lane-dense last dim

    # Explicit VMEM budget: double-buffered x block + T + output + scratch,
    # with 2x headroom, clamped to [32 MiB, 64 MiB] (v7x physical = 64 MiB).
    est = (2 * Bt * Ct * HW * x.dtype.itemsize
           + 2 * t_cat.size * t_cat.dtype.itemsize
           + 2 * Bt * HW * x.dtype.itemsize
           + 2 * Bt * HW * 4)
    vmem_limit = int(min(max(2 * est, 32 * 1024 * 1024), 64 * 1024 * 1024))

    if Ct == C:
        # Fast path: whole channel reduction in one grid step, no scratch refs.
        grid = (B // Bt,)
        in_specs = [
            pl.BlockSpec((Bt, C, HW), lambda b: (b, 0, 0)),
            pl.BlockSpec((2 * HW, HW), lambda b: (0, 0)),
        ]
        out_specs = pl.BlockSpec((Bt, HW), lambda b: (b, 0))
        scratch_shapes = []
        kernel = _sa_kernel_single
        dim_sem = ("parallel",)
    else:
        grid = (B // Bt, C // Ct)
        in_specs = [
            pl.BlockSpec((Bt, Ct, HW), lambda b, c: (b, c, 0)),
            pl.BlockSpec((2 * HW, HW), lambda b, c: (0, 0)),
        ]
        out_specs = pl.BlockSpec((Bt, HW), lambda b, c: (b, 0))
        scratch_shapes = [
            pltpu.VMEM((Bt, HW), jnp.float32),   # running channel sum
            pltpu.VMEM((Bt, HW), jnp.float32),   # running channel max
        ]
        kernel = _sa_kernel_tiled
        dim_sem = ("parallel", "arbitrary")

    out_flat = pl.pallas_call(
        kernel,
        out_shape=jax.ShapeDtypeStruct((B, HW), x.dtype),
        grid_spec=pltpu.PrefetchScalarGridSpec(
            num_scalar_prefetch=0,
            grid=grid,
            in_specs=in_specs,
            out_specs=out_specs,
            scratch_shapes=scratch_shapes,
        ),
        compiler_params=pltpu.CompilerParams(
            dimension_semantics=dim_sem,
            vmem_limit_bytes=vmem_limit),
    )(x_flat, t_cat)
    return out_flat.reshape(B, 1, H, W)


def spatial_attention_ref(x, w):
    """Pure-JAX reference mirroring the PyTorch SpatialAttention.forward."""
    avg = jnp.mean(x, axis=1, keepdims=True)
    mx = jnp.max(x, axis=1, keepdims=True)
    xc = jnp.concatenate([avg, mx], axis=1)
    out = jax.lax.conv_general_dilated(
        xc, w, window_strides=(1, 1), padding=((PAD, PAD), (PAD, PAD)),
        dimension_numbers=("NCHW", "OIHW", "NCHW"),
        precision=jax.lax.Precision.HIGHEST)
    return jax.nn.sigmoid(out)


if __name__ == "__main__":
    key = jax.random.PRNGKey(0)
    kx, kw, kx2 = jax.random.split(key, 3)

    # --- test 1: fast path (Ct == C), toy Darknet-CBAM shape -----------------
    B, C, H, W = 2, 4, 16, 16
    x = jax.random.normal(kx, (B, C, H, W), dtype=jnp.float32)
    # Conv weight (shape from nn.Conv2d(2, 1, 7, padding=3, bias=False)).
    w = 0.1 * jax.random.normal(kw, (1, 2, KSIZE, KSIZE), dtype=jnp.float32)

    # Build the fused Toeplitz conv matrix once (cache per weight).
    t_cat = build_spatial_conv_matrix(w, H, W, C)

    out = jax.block_until_ready(spatial_attention(x, w, t_cat=t_cat))
    ref = spatial_attention_ref(x, w)
    assert out.shape == (B, 1, H, W)
    # bf16 MXU operands w/ f32 accumulation; sigmoid output -> 1e-2 tolerance.
    assert jnp.allclose(out, ref, atol=1e-2, rtol=1e-2), "mismatch vs reference (single)"

    # --- test 2: channel-tiled accumulator path ------------------------------
    C2 = 16
    x2 = jax.random.normal(kx2, (B, C2, H, W), dtype=jnp.float32)
    t_cat2 = build_spatial_conv_matrix(w, H, W, C2)
    out2 = jax.block_until_ready(
        spatial_attention(x2, w, t_cat=t_cat2, channel_tile=8))
    ref2 = spatial_attention_ref(x2, w)
    assert out2.shape == (B, 1, H, W)
    assert jnp.allclose(out2, ref2, atol=1e-2, rtol=1e-2), "mismatch vs reference (tiled)"

    print("KERNEL_OK")
</pallas_src>

<mosaic_0001>
module attributes {stable_mosaic.version = 11 : i64} {
  func.func @_sa_kernel_single(%arg0: i32, %arg1: memref<2x4x256xf32, #tpu.memory_space<vmem>>, %arg2: memref<512x256xbf16, #tpu.memory_space<vmem>>, %arg3: memref<2x256xf32, #tpu.memory_space<vmem>>) attributes {dimension_semantics = [#tpu.dimension_semantics<parallel>], iteration_bounds = array<i64: 1>, scalar_prefetch = 0 : i64, scratch_operands = 0 : i64, tpu.core_type = #tpu.core_type<tc>, window_params = [{transform_indices = @transform_0, window_bounds = array<i64: 2, 4, 256>}, {pipeline_mode = #tpu.pipeline_mode<synchronous>, transform_indices = @transform_1, window_bounds = array<i64: 512, 256>}, {transform_indices = @transform_2, window_bounds = array<i64: 2, 256>}]} {
    %c0 = arith.constant 0 : index
    %c0_0 = arith.constant 0 : index
    %c0_1 = arith.constant 0 : index
    %0 = vector.load %arg1[%c0, %c0_0, %c0_1] : memref<2x4x256xf32, #tpu.memory_space<vmem>>, vector<2x4x256xf32>
    %cst = arith.constant dense<0.000000e+00> : vector<2x256xf32>
    %1 = vector.multi_reduction <add>, %0, %cst [1] : vector<2x4x256xf32> to vector<2x256xf32>
    %cst_2 = arith.constant dense<0xFF800000> : vector<2x256xf32>
    %2 = vector.multi_reduction <maximumf>, %0, %cst_2 [1] : vector<2x4x256xf32> to vector<2x256xf32>
    %3 = tpu.concatenate %1, %2 in 1 : vector<2x256xf32>, vector<2x256xf32> -> vector<2x512xf32>
    %4 = arith.truncf %3 : vector<2x512xf32> to vector<2x512xbf16>
    %c0_3 = arith.constant 0 : index
    %c0_4 = arith.constant 0 : index
    %5 = vector.load %arg2[%c0_3, %c0_4] : memref<512x256xbf16, #tpu.memory_space<vmem>>, vector<512x256xbf16>
    %cst_5 = arith.constant dense<0.000000e+00> : vector<2x256xf32>
    %6 = tpu.matmul %4, %5, %cst_5 {dimension_numbers = #tpu.dot_dimension_numbers<[1], [0], [0], [1], [0, 0, 1, 1], [], []>} : vector<2x512xbf16>, vector<512x256xbf16>, vector<2x256xf32> -> vector<2x256xf32>
    %7 = arith.negf %6 : vector<2x256xf32>
    %8 = math.exp %7 : vector<2x256xf32>
    %cst_6 = arith.constant 1.000000e+00 : f32
    %9 = vector.broadcast %cst_6 : f32 to vector<2x256xf32>
    %10 = arith.addf %9, %8 : vector<2x256xf32>
    %11 = arith.divf %9, %10 : vector<2x256xf32>
    %c0_7 = arith.constant 0 : index
    %c0_8 = arith.constant 0 : index
    %12 = vector.load %arg3[%c0_7, %c0_8] : memref<2x256xf32, #tpu.memory_space<vmem>>, vector<2x256xf32>
    tpu.vector_store %arg3[%c0_7, %c0_8], %11 {strides = array<i32>} : memref<2x256xf32, #tpu.memory_space<vmem>>, vector<2x256xf32>,
    return
  }
  func.func @transform_0(%arg0: i32) -> (i32, i32, i32) {
    %c0_i32 = arith.constant 0 : i32
    %c0_i32_0 = arith.constant 0 : i32
    %c0_i32_1 = arith.constant 0 : i32
    return %arg0, %c0_i32, %c0_i32_0 : i32, i32, i32
  }
  func.func @transform_1(%arg0: i32) -> (i32, i32) {
    %c0_i32 = arith.constant 0 : i32
    %c0_i32_0 = arith.constant 0 : i32
    %c0_i32_1 = arith.constant 0 : i32
    return %c0_i32, %c0_i32_0 : i32, i32
  }
  func.func @transform_2(%arg0: i32) -> (i32, i32) {
    %c0_i32 = arith.constant 0 : i32
    %c0_i32_0 = arith.constant 0 : i32
    return %arg0, %c0_i32 : i32, i32
  }
}

</mosaic_0001>

<bundles_post_ra>
// kernel: tpu_custom_call.1
= control target key start
LH: loop header
LB: loop body
LE: loop exit
PB: predicated region body
PF: predicated region fallthrough
CT: control target
= control target key end

     0   :  { %7 = vsyncpa [#allocation3], 0  ;;  %s952_s0 = inlined_call_operand.hbm [shape: f32[2,4,256], index: 0, kind: input, shape index: {}]   ;;  %s953_s1 = inlined_call_operand.hbm [shape: bf16[512,256], index: 1, kind: input, shape index: {}]   ;;  %s954_s2 = inlined_call_operand.hbm [shape: f32[2,256], index: 2, kind: output, shape index: {}]  }
   0x1   :  { %8 = vsyncpa [#allocation6], 0 }
   0x2   :  { %9 = vsyncpa [#allocation4], 0  ;;  %s884_s9 = smov [#allocation2]   ;;  %s812_s13 = scalar_lea.hbm %s952_s0, 256 }
   0x3   :  { %s15_s10 = sshll.u32 %s884_s9, 4  ;;  %p813_p0 = scmp.ne.s32.totalorder %s952_s0, %s812_s13  ;;  %s16_s10 = int_to_ptr.vmem [resolvable:$true] %s15_s10 }
   0x4   :  { %p816_p1 = scmp.lt.u32.totalorder %s812_s13, %s952_s0 }
   0x6   :  { %p818_p2 = pnand %p816_p1, %p813_p0 }
   0x8   :  { %821 = shalt.err (!%p818_p2)
}
   0x9   :  { %s822_s18 = scalar_lea.vmem %s16_s10, 256  ;;  %p827_p4 = scmp.lt.s32.totalorder %s16_s10, %s16_s10 }
   0xa   :  { %p823_p3 = scmp.ne.s32.totalorder %s16_s10, %s822_s18  ;;  %p828_p5 = scmp.lt.s32.totalorder %s822_s18, %s822_s18 }
   0xc   :  { %p829_p6 = por %p828_p5, %p827_p4 }
   0xe   :  { %p830_p7 = pnand %p829_p6, %p823_p3 }
  0x10   :  { %833 = shalt.err (!%p830_p7)
}
  0x11   :  { %s885_s19 = smov 128   ;;  %s886_s20 = smov 8  }
  0x12   :  { %21 = dma.hbm_to_vmem [thread:$0]  %s952_s0, 256, %s16_s10, [#allocation3], %s885_s19, %s885_s19, %s886_s20  }
  0x13   :  { %s887_s23 = smov [#allocation5]   ;;  %s834_s27 = scalar_lea.hbm %s953_s1, 8192 }
  0x14   :  { %s27_s24 = sshll.u32 %s887_s23, 4  ;;  %p835_p8 = scmp.ne.s32.totalorder %s953_s1, %s834_s27  ;;  %s28_s24 = int_to_ptr.vmem [resolvable:$true] %s27_s24 }
  0x15   :  { %p838_p9 = scmp.lt.u32.totalorder %s834_s27, %s953_s1 }
  0x17   :  { %p840_p10 = pnand %p838_p9, %p835_p8 }
  0x19   :  { %843 = shalt.err (!%p840_p10)
}
  0x1a   :  { %s844_s4 = scalar_lea.vmem %s28_s24, 8192  ;;  %p849_p12 = scmp.lt.s32.totalorder %s28_s24, %s28_s24 }
  0x1b   :  { %p845_p11 = scmp.ne.s32.totalorder %s28_s24, %s844_s4  ;;  %p850_p13 = scmp.lt.s32.totalorder %s844_s4, %s844_s4 }
  0x1d   :  { %p851_p0 = por %p850_p13, %p849_p12 }
  0x1f   :  { %p852_p1 = pnand %p851_p0, %p845_p11 }
  0x21   :  { %855 = shalt.err (!%p852_p1)
}
  0x22   :  { %33 = dma.hbm_to_vmem [thread:$0]  %s953_s1, 8192, %s28_s24, [#allocation6], %s885_s19, %s885_s19, %s886_s20  }
  0x23   :  { %878 = dma.done.wait [#allocation3], 256  }
  0x24   :  { %879 = vsyncadd [#allocation3], 4294967040 }
  0x25   :  { %880 = dma.done.wait [#allocation6], 8192  }
  0x26   :  { %881 = vsyncadd [#allocation6], 4294959104  ;;  %v706_v0 = vld [vmem:[#allocation5 + $0x4] ss:$8 sps:$4 sm:$0xff]   ;;  %v710_v2 = vld [vmem:[#allocation5] ss:$8 sps:$4 sm:$0xff]  }
  0x27   :  { %v708_v1 = vld [vmem:[#allocation5 + $0x104] ss:$8 sps:$4 sm:$0xff]   ;;  %510 = vmatprep.subr.bf16.mxu1 %v706_v0  ;;  %v711_v3 = vld [vmem:[#allocation5 + $0x100] ss:$8 sps:$4 sm:$0xff]   ;;  %v712_v4 = vld [vmem:[#allocation5 + $0x14] ss:$8 sps:$4 sm:$0xff]  }
  0x28   :  { %551 = vmatprep.subr.bf16.mxu0 %v708_v1  ;;  %511 = vmatpush1.bf16.msra.mxu1 %v710_v2  ;;  %v714_v5 = vld [vmem:[#allocation5 + $0x114] ss:$8 sps:$4 sm:$0xff]   ;;  %v716_v6 = vld [vmem:[#allocation5 + $0x10] ss:$8 sps:$4 sm:$0xff]   ;;  %v718_v8 = vld [vmem:[#allocation5 + $0x24] ss:$8 sps:$4 sm:$0xff]  }
  0x29   :  { %552 = vmatpush1.bf16.msra.mxu0 %v711_v3  ;;  %512 = vmatprep.subr.bf16.mxu1 %v712_v4  ;;  %v717_v7 = vld [vmem:[#allocation5 + $0x110] ss:$8 sps:$4 sm:$0xff]   ;;  %v720_v9 = vld [vmem:[#allocation5 + $0x124] ss:$8 sps:$4 sm:$0xff]   ;;  %v722_v10 = vld [vmem:[#allocation5 + $0x20] ss:$8 sps:$4 sm:$0xff]  }
  0x2a   :  { %553 = vmatprep.subr.bf16.mxu0 %v714_v5  ;;  %v723_v11 = vld [vmem:[#allocation5 + $0x120] ss:$8 sps:$4 sm:$0xff]   ;;  %v724_v12 = vld [vmem:[#allocation5 + $0x34] ss:$8 sps:$4 sm:$0xff]   ;;  %v728_v14 = vld [vmem:[#allocation5 + $0x30] ss:$8 sps:$4 sm:$0xff]  }
  0x2b   :  { %v726_v13 = vld [vmem:[#allocation5 + $0x134] ss:$8 sps:$4 sm:$0xff]   ;;  %v729_v15 = vld [vmem:[#allocation5 + $0x130] ss:$8 sps:$4 sm:$0xff]   ;;  %v730_v16 = vld [vmem:[#allocation5 + $0x44] ss:$8 sps:$4 sm:$0xff]  }
  0x2c   :  { %513 = vmatpush1.bf16.msra.mxu1 %v716_v6  ;;  %v732_v17 = vld [vmem:[#allocation5 + $0x144] ss:$8 sps:$4 sm:$0xff]   ;;  %v734_v18 = vld [vmem:[#allocation5 + $0x40] ss:$8 sps:$4 sm:$0xff]   ;;  %v736_v20 = vld [vmem:[#allocation5 + $0x54] ss:$8 sps:$4 sm:$0xff]  }
  0x2d   :  { %554 = vmatpush1.bf16.msra.mxu0 %v717_v7  ;;  %514 = vmatprep.subr.bf16.mxu1 %v718_v8  ;;  %v735_v19 = vld [vmem:[#allocation5 + $0x140] ss:$8 sps:$4 sm:$0xff]   ;;  %v738_v21 = vld [vmem:[#allocation5 + $0x154] ss:$8 sps:$4 sm:$0xff]   ;;  %v740_v22 = vld [vmem:[#allocation5 + $0x50] ss:$8 sps:$4 sm:$0xff]  }
  0x2e   :  { %555 = vmatprep.subr.bf16.mxu0 %v720_v9  ;;  %v741_v23 = vld [vmem:[#allocation5 + $0x150] ss:$8 sps:$4 sm:$0xff]   ;;  %v742_v24 = vld [vmem:[#allocation5 + $0x64] ss:$8 sps:$4 sm:$0xff]   ;;  %v746_v26 = vld [vmem:[#allocation5 + $0x60] ss:$8 sps:$4 sm:$0xff]  }
  0x2f   :  { %v744_v25 = vld [vmem:[#allocation5 + $0x164] ss:$8 sps:$4 sm:$0xff]   ;;  %v747_v27 = vld [vmem:[#allocation5 + $0x160] ss:$8 sps:$4 sm:$0xff]   ;;  %v748_v28 = vld [vmem:[#allocation5 + $0x74] ss:$8 sps:$4 sm:$0xff]  }
  0x30   :  { %515 = vmatpush1.bf16.msra.mxu1 %v722_v10  ;;  %v750_v29 = vld [vmem:[#allocation5 + $0x174] ss:$8 sps:$4 sm:$0xff]   ;;  %v752_v30 = vld [vmem:[#allocation5 + $0x70] ss:$8 sps:$4 sm:$0xff]   ;;  %v754_v32 = vld [vmem:[#allocation5 + $0x84] ss:$8 sps:$4 sm:$0xff]  }
  0x31   :  { %556 = vmatpush1.bf16.msra.mxu0 %v723_v11  ;;  %516 = vmatprep.subr.bf16.mxu1 %v724_v12  ;;  %v753_v31 = vld [vmem:[#allocation5 + $0x170] ss:$8 sps:$4 sm:$0xff]   ;;  %v756_v33 = vld [vmem:[#allocation5 + $0x184] ss:$8 sps:$4 sm:$0xff]   ;;  %v758_v34 = vld [vmem:[#allocation5 + $0x80] ss:$8 sps:$4 sm:$0xff]  }
  0x32   :  { %557 = vmatprep.subr.bf16.mxu0 %v726_v13  ;;  %v759_v35 = vld [vmem:[#allocation5 + $0x180] ss:$8 sps:$4 sm:$0xff]   ;;  %v760_v36 = vld [vmem:[#allocation5 + $0x94] ss:$8 sps:$4 sm:$0xff]   ;;  %v764_v38 = vld [vmem:[#allocation5 + $0x90] ss:$8 sps:$4 sm:$0xff]  }
  0x33   :  { %v762_v37 = vld [vmem:[#allocation5 + $0x194] ss:$8 sps:$4 sm:$0xff]   ;;  %v765_v39 = vld [vmem:[#allocation5 + $0x190] ss:$8 sps:$4 sm:$0xff]   ;;  %v766_v40 = vld [vmem:[#allocation5 + $0xa4] ss:$8 sps:$4 sm:$0xff]  }
  0x34   :  { %517 = vmatpush1.bf16.msra.mxu1 %v728_v14  ;;  %v768_v41 = vld [vmem:[#allocation5 + $0x1a4] ss:$8 sps:$4 sm:$0xff]   ;;  %v770_v42 = vld [vmem:[#allocation5 + $0xa0] ss:$8 sps:$4 sm:$0xff]   ;;  %v772_v44 = vld [vmem:[#allocation5 + $0xb4] ss:$8 sps:$4 sm:$0xff]  }
  0x35   :  { %558 = vmatpush1.bf16.msra.mxu0 %v729_v15  ;;  %518 = vmatprep.subr.bf16.mxu1 %v730_v16  ;;  %v771_v43 = vld [vmem:[#allocation5 + $0x1a0] ss:$8 sps:$4 sm:$0xff]   ;;  %vm48_vm0 = vcmask 1043456   ;;  %v774_v45 = vld [vmem:[#allocation5 + $0x1b4] ss:$8 sps:$4 sm:$0xff]   ;;  %vm109_vm1 = vcmask 1041409  }
  0x36   :  { %559 = vmatprep.subr.bf16.mxu0 %v732_v17  ;;  %v776_v46 = vld [vmem:[#allocation5 + $0xb0] ss:$8 sps:$4 sm:$0xff]   ;;  %v778_v53 = vld [vmem:[#allocation5 + $0xc4] ss:$8 sps:$4 sm:$0xff]   ;;  %v782_v7 = vld [vmem:[#allocation5 + $0xc0] ss:$8 sps:$4 sm:$0xff]  }
  0x37   :  { %v40_v47 = vld [vmem:[#allocation2] sm:$0xff]  ;;  %v41_v49 = vld [vmem:[#allocation2 + $0x8] sm:$0xff]  ;;  %v780_v58 = vld [vmem:[#allocation5 + $0x1c4] ss:$8 sps:$4 sm:$0xff]   ;;  %s888_s1 = smov [#allocation7]  }
  0x38   :  { %519 = vmatpush1.bf16.msra.mxu1 %v734_v18  ;;  %v777_v48 = vld [vmem:[#allocation5 + $0x1b0] ss:$8 sps:$4 sm:$0xff]   ;;  %v44_v50 = vcombine.high %v40_v47, %v40_v47  ;;  %v49_v51 = vsel %vm48_vm0, %v40_v47, 0.0  ;;  %v77_v52 = vsel %vm48_vm0, %v40_v47, -inf  ;;  %v45_v54 = vcombine.high %v41_v49, %v41_v49  ;;  %v783_v8 = vld [vmem:[#allocation5 + $0x1c0] ss:$8 sps:$4 sm:$0xff]  }
  0x39   :  { %560 = vmatpush1.bf16.msra.mxu0 %v735_v19  ;;  %520 = vmatprep.subr.bf16.mxu1 %v736_v20  ;;  %v50_v55 = vrot.slane %v49_v51, 4  ;;  %v63_v56 = vsel %vm48_vm0, %v41_v49, 0.0  ;;  %v78_v57 = vrot.slane %v77_v52, 4  ;;  %v91_v62 = vsel %vm48_vm0, %v41_v49, -inf  ;;  %v784_v13 = vld [vmem:[#allocation5 + $0xd4] ss:$8 sps:$4 sm:$0xff]  }
  0x3a   :  { %561 = vmatprep.subr.bf16.mxu0 %v738_v21  ;;  %v56_v59 = vsel %vm48_vm0, %v44_v50, 0.0  ;;  %v84_v60 = vsel %vm48_vm0, %v44_v50, -inf  ;;  %v64_v61 = vrot.slane %v63_v56, 4  ;;  %v70_v0 = vsel %vm48_vm0, %v45_v54, 0.0  ;;  %v786_v14 = vld [vmem:[#allocation5 + $0x1d4] ss:$8 sps:$4 sm:$0xff]  }
  0x3b   :  { %v57_v63 = vrot.slane %v56_v59, 4  ;;  %v85_v1 = vrot.slane %v84_v60, 4  ;;  %v98_v2 = vsel %vm48_vm0, %v45_v54, -inf  ;;  %v71_v3 = vrot.slane %v70_v0, 4  ;;  %v794_v47 = vld [vmem:[#allocation5 + $0xe0] ss:$8 sps:$4 sm:$0xff]  }
  0x3c   :  { %521 = vmatpush1.bf16.msra.mxu1 %v740_v22  ;;  %v99_v4 = vrot.slane %v98_v2, 4  ;;  %v51_v5 = vadd.f32 %v50_v55, %v49_v51  ;;  %v65_v6 = vadd.f32 %v64_v61, %v63_v56  ;;  %v79_v11 = vmax.f32 %v77_v52, %v78_v57  ;;  %v798_v54 = vld [vmem:[#allocation5 + $0x1f4] ss:$8 sps:$4 sm:$0xff]   ;;  %v800_v61 = vld [vmem:[#allocation5 + $0xf0] ss:$8 sps:$4 sm:$0xff]   ;;  %s622_s6 = sshll.u32 %s888_s1, 4  ;;  %s623_s6 = int_to_ptr.vmem [resolvable:$true] %s622_s6 }
  0x3d   :  { %562 = vmatpush1.bf16.msra.mxu0 %v741_v23  ;;  %522 = vmatprep.subr.bf16.mxu1 %v742_v24  ;;  %v58_v9 = vadd.f32 %v57_v63, %v56_v59  ;;  %v86_v10 = vmax.f32 %v84_v60, %v85_v1  ;;  %v92_v12 = vrot.slane %v91_v62, 4  ;;  %v72_v15 = vadd.f32 %v71_v3, %v70_v0  ;;  %s856_s7 = scalar_lea.vmem %s623_s6, 64  ;;  %p861_p3 = scmp.lt.s32.totalorder %s623_s6, %s623_s6 }
  0x3e   :  { %563 = vmatprep.subr.bf16.mxu0 %v744_v25  ;;  %v100_v16 = vmax.f32 %v98_v2, %v99_v4  ;;  %v52_v17 = vrot.slane %v51_v5, 2  ;;  %v66_v18 = vrot.slane %v65_v6, 2  ;;  %v80_v21 = vrot.slane %v79_v11, 2  ;;  %p857_p2 = scmp.ne.s32.totalorder %s623_s6, %s856_s7  ;;  %p862_p4 = scmp.lt.s32.totalorder %s856_s7, %s856_s7 }
  0x3f   :  { %v59_v19 = vrot.slane %v58_v9, 2  ;;  %v87_v20 = vrot.slane %v86_v10, 2  ;;  %v93_v22 = vmax.f32 %v91_v62, %v92_v12  ;;  %v73_v23 = vrot.slane %v72_v15, 2  ;;  %v801_v62 = vld [vmem:[#allocation5 + $0x1f0] ss:$8 sps:$4 sm:$0xff]  }
  0x40   :  { %523 = vmatpush1.bf16.msra.mxu1 %v746_v26  ;;  %v101_v24 = vrot.slane %v100_v16, 2  ;;  %v53_v25 = vadd.f32 %v52_v17, %v51_v5  ;;  %v67_v26 = vadd.f32 %v66_v18, %v65_v6  ;;  %p863_p5 = por %p862_p4, %p861_p3 }
  0x41   :  { %564 = vmatpush1.bf16.msra.mxu0 %v747_v27  ;;  %524 = vmatprep.subr.bf16.mxu1 %v748_v28  ;;  %v788_v27 = vld [vmem:[#allocation5 + $0xd0] ss:$8 sps:$4 sm:$0xff]  }
  0x42   :  { %565 = vmatprep.subr.bf16.mxu0 %v750_v29  ;;  %v789_v28 = vld [vmem:[#allocation5 + $0x1d0] ss:$8 sps:$4 sm:$0xff]   ;;  %v60_v29 = vadd.f32 %v59_v19, %v58_v9  ;;  %p864_p6 = pnand %p863_p5, %p857_p2 }
  0x44   :  { %525 = vmatpush1.bf16.msra.mxu1 %v752_v30  ;;  %v88_v30 = vmax.f32 %v86_v10, %v87_v20 }
  0x45   :  { %566 = vmatpush1.bf16.msra.mxu0 %v753_v31  ;;  %526 = vmatprep.subr.bf16.mxu1 %v754_v32  ;;  %v81_v31 = vmax.f32 %v79_v11, %v80_v21  ;;  %v94_v32 = vrot.slane %v93_v22, 2 }
  0x46   :  { %567 = vmatprep.subr.bf16.mxu0 %v756_v33  ;;  %v790_v33 = vld [vmem:[#allocation5 + $0xe4] ss:$8 sps:$4 sm:$0xff]  }
  0x48   :  { %527 = vmatpush1.bf16.msra.mxu1 %v758_v34  ;;  %v792_v34 = vld [vmem:[#allocation5 + $0x1e4] ss:$8 sps:$4 sm:$0xff]  }
  0x49   :  { %568 = vmatpush1.bf16.msra.mxu0 %v759_v35  ;;  %528 = vmatprep.subr.bf16.mxu1 %v760_v36  ;;  %v74_v35 = vadd.f32 %v73_v23, %v72_v15  ;;  %v102_v36 = vmax.f32 %v100_v16, %v101_v24 }
  0x4a   :  { %569 = vmatprep.subr.bf16.mxu0 %v762_v37  ;;  %v54_v37 = vrot.slane %v53_v25, 1 }
  0x4c   :  { %529 = vmatpush1.bf16.msra.mxu1 %v764_v38  ;;  %v68_v38 = vrot.slane %v67_v26, 1 }
  0x4d   :  { %570 = vmatpush1.bf16.msra.mxu0 %v765_v39  ;;  %530 = vmatprep.subr.bf16.mxu1 %v766_v40  ;;  %v61_v39 = vrot.slane %v60_v29, 1  ;;  %v89_v40 = vrot.slane %v88_v30, 1 }
  0x4e   :  { %571 = vmatprep.subr.bf16.mxu0 %v768_v41  ;;  %v82_v41 = vrot.slane %v81_v31, 1 }
  0x4f   :  { %v62_v49 = vadd.f32 %v61_v39, %v60_v29  ;;  %v90_v50 = vmax.f32 %v88_v30, %v89_v40 }
  0x50   :  { %531 = vmatpush1.bf16.msra.mxu1 %v770_v42  ;;  %v95_v42 = vmax.f32 %v93_v22, %v94_v32  ;;  %v83_v51 = vmax.f32 %v81_v31, %v82_v41 }
  0x51   :  { %572 = vmatpush1.bf16.msra.mxu0 %v771_v43  ;;  %532 = vmatprep.subr.bf16.mxu1 %v772_v44  ;;  %v75_v43 = vrot.slane %v74_v35, 1  ;;  %v103_v44 = vrot.slane %v102_v36, 1 }
  0x52   :  { %573 = vmatprep.subr.bf16.mxu0 %v774_v45  ;;  %v55_v45 = vadd.f32 %v54_v37, %v53_v25  ;;  %v96_v52 = vrot.slane %v95_v42, 1 }
  0x53   :  { %v76_v55 = vadd.f32 %v75_v43, %v74_v35  ;;  %v104_v56 = vmax.f32 %v102_v36, %v103_v44 }
  0x54   :  { %533 = vmatpush1.bf16.msra.mxu1 %v776_v46  ;;  %v69_v46 = vadd.f32 %v68_v38, %v67_v26  ;;  %v97_v57 = vmax.f32 %v95_v42, %v96_v52 }
  0x55   :  { %574 = vmatpush1.bf16.msra.mxu0 %v777_v48  ;;  %534 = vmatprep.subr.bf16.mxu1 %v778_v53  ;;  %v795_v48 = vld [vmem:[#allocation5 + $0x1e0] ss:$8 sps:$4 sm:$0xff]   ;;  %v796_v53 = vld [vmem:[#allocation5 + $0xf4] ss:$8 sps:$4 sm:$0xff]   ;;  %v119_v59 = vsel %vm109_vm1, %v104_v56, %v90_v50 }
  0x56   :  { %575 = vmatprep.subr.bf16.mxu0 %v780_v58  ;;  %v111_v58 = vsel %vm109_vm1, %v76_v55, %v62_v49  ;;  %v110_v60 = vsel %vm109_vm1, %v69_v46, %v55_v45  ;;  %v125_v0 = vpack.c.bf16 %v119_v59, %v119_v59  ;;  %v118_v1 = vsel %vm109_vm1, %v97_v57, %v83_v51 }
  0x57   :  { %v123_v63 = vpack.c.bf16 %v111_v58, %v111_v58  ;;  %v122_v2 = vpack.c.bf16 %v110_v60, %v110_v60  ;;  %v124_v3 = vpack.c.bf16 %v118_v1, %v118_v1 }
  0x58   :  { %535 = vmatpush1.bf16.msra.mxu1 %v782_v7  ;;  %583 = vmatprep.mubr.bf16.mxu0 %v125_v0 }
  0x59   :  { %576 = vmatpush1.bf16.msra.mxu0 %v783_v8  ;;  %536 = vmatprep.subr.bf16.mxu1 %v784_v13 }
  0x5a   :  { %577 = vmatprep.subr.bf16.mxu0 %v786_v14  ;;  %542 = vmatprep.mubr.bf16.mxu1 %v123_v63 }
  0x5c   :  { %537 = vmatpush1.bf16.msra.mxu1 %v788_v27 }
  0x5d   :  { %578 = vmatpush1.bf16.msra.mxu0 %v789_v28  ;;  %538 = vmatprep.subr.bf16.mxu1 %v790_v33 }
  0x5e   :  { %579 = vmatprep.subr.bf16.mxu0 %v792_v34 }
  0x60   :  { %539 = vmatpush1.bf16.msra.mxu1 %v794_v47 }
  0x61   :  { %580 = vmatpush1.bf16.msra.mxu0 %v795_v48  ;;  %540 = vmatprep.subr.bf16.mxu1 %v796_v53 }
  0x62   :  { %581 = vmatprep.subr.bf16.mxu0 %v798_v54 }
  0x64   :  { %541 = vmatpush1.bf16.msra.mxu1 %v800_v61 }
  0x65   :  { %582 = vmatpush1.bf16.msra.mxu0 %v801_v62 }
  0x67   :  { %543 = vmatmul.mubr.bf16.vlgmr.msra.gmra.mrb[0].mxu1 %v122_v2 }
  0x68   :  { %584 = vmatmul.mubr.bf16.vlgmr.msra.gmra.mrb[0].mxu0 %v124_v3 }
 0x13a   :  { %v544_v4 = vpop.f32.mrb[0].mxu1 }
 0x13b   :  { %v585_v5 = vpop.f32.mrb[0].mxu0  ;;  %v546_v7 = vpop.f32.mrb[1].mxu1 }
 0x13c   :  { %v586_v6 = vadd.f32 %v585_v5, %v544_v4  ;;  %v587_v8 = vpop.f32.mrb[1].mxu0  ;;  %v548_v10 = vpop.f32.mrb[2].mxu1 }
 0x13d   :  { %v588_v9 = vadd.f32 %v587_v8, %v546_v7  ;;  %v589_v11 = vpop.f32.mrb[2].mxu0  ;;  %v549_v13 = vpop.f32.mrb[3].mxu1 }
 0x13e   :  { %v696_v12 = vmul.f32 -1.442695, %v586_v6  ;;  %v590_v14 = vpop.f32.mrb[3].mxu0 }
 0x13f   :  { %v697_v15 = vmul.f32 -1.442695, %v588_v9 }
 0x140   :  { %804 = vpow2.f32 %v696_v12 }
 0x141   :  { %806 = vpow2.f32 %v697_v15 }
 0x14a   :  { %v805_v16 = vpop.eup %804 }
 0x14b   :  { %v807_v17 = vpop.eup %806  ;;  %v598_v18 = vadd.f32 1.0, %v805_v16 }
 0x14c   :  { %v599_v19 = vadd.f32 1.0, %v807_v17 }
 0x14d   :  { %808 = vrcp.f32 %v598_v18 }
 0x14e   :  { %810 = vrcp.f32 %v599_v19 }
 0x157   :  { %v809_v20 = vpop.eup %808 }
 0x158   :  { %v811_v21 = vpop.eup %810 }
 0x159   :  { %v606_v22 = vcombine.low %v809_v20, %v811_v21 }
 0x15b   :  { %698 = vst.sshfl [vmem:[#allocation7] sm:$0x33 pattern:$0x76325410] %v606_v22 }
 0x15c   :  { %867 = shalt.err (!%p864_p6)
}
 0x15d   :  { %s868_s10 = scalar_lea.hbm %s954_s2, 64 }
 0x15e   :  { %p869_p7 = scmp.ne.s32.totalorder %s954_s2, %s868_s10  ;;  %p872_p8 = scmp.lt.u32.totalorder %s868_s10, %s954_s2 }
 0x160   :  { %p874_p9 = pnand %p872_p8, %p869_p7 }
 0x162   :  { %877 = shalt.err (!%p874_p9)
}
 0x163   :  { %625 = dma.vmem_to_hbm [thread:$0]  %s623_s6, 64, %s954_s2, [#allocation4]  }
 0x164   :  { %882 = dma.done.wait [#allocation4], 64  }
 0x165   :  { %883 = vsyncadd [#allocation4], 4294967232 }
 0x166   :  { %629 = vsyncpa [#allocation3], 1 }
 0x167   :  { %630 = vsyncpa [#allocation6], 1 }
 0x168   :  { %631 = vsyncpa [#allocation4], 1 }

</bundles_post_ra>
